<compile_context>
chip_gen: v6e
topology: v6e:2x2x1
jax: 0.10.0
libtpu: 0.0.40
codegen_flags: <defaults>
</compile_context>

<pallas_src>
import functools

import jax
import jax.numpy as jnp
from jax.experimental import pallas as pl
from jax.experimental.pallas import tpu as pltpu

EPS = 1e-5

# Tile targets (elements).  2*(tm*tk + tk*tn)*2B + tm*tn*(2B out + 4B acc)
# at 512^3 is ~4.5 MB, far below the 48 MiB limit requested below.
TM_TARGET = 512
TN_TARGET = 512
TK_TARGET = 512
VMEM_LIMIT_BYTES = 48 * 1024 * 1024


# ----------------------------- Pallas kernels ------------------------------

def _matmul_bias_kernel(x_ref, w_ref, b_ref, o_ref, acc_ref, *, relu):
    """acc += x @ w (bf16 in, f32 acc); finalize: +bias, optional ReLU."""
    @pl.when(pl.program_id(2) == 0)
    def _():
        acc_ref[...] = jnp.zeros_like(acc_ref)

    acc_ref[...] += jnp.dot(x_ref[...], w_ref[...],
                            preferred_element_type=jnp.float32)

    @pl.when(pl.program_id(2) == pl.num_programs(2) - 1)
    def _():
        y = acc_ref[...] + b_ref[...]
        if relu:
            y = jnp.maximum(y, 0.0)
        o_ref[...] = y.astype(o_ref.dtype)


def _matmul_bias_res_kernel(x_ref, w_ref, b_ref, r_ref, o_ref, acc_ref, *,
                            relu):
    """Same as above but fuses the residual add before the (optional) ReLU."""
    @pl.when(pl.program_id(2) == 0)
    def _():
        acc_ref[...] = jnp.zeros_like(acc_ref)

    acc_ref[...] += jnp.dot(x_ref[...], w_ref[...],
                            preferred_element_type=jnp.float32)

    @pl.when(pl.program_id(2) == pl.num_programs(2) - 1)
    def _():
        y = acc_ref[...] + b_ref[...] + r_ref[...].astype(jnp.float32)
        if relu:
            y = jnp.maximum(y, 0.0)
        o_ref[...] = y.astype(o_ref.dtype)


def _tile(dim, target, base):
    """Largest divisor of `dim` that is <= target and a multiple of `base`
    (falls back to the full dim, which is always legal for BlockSpec)."""
    if dim <= target:
        return dim
    t = (target // base) * base
    while t > base and dim % t:
        t -= base
    return t if (t > 0 and dim % t == 0) else dim


def fused_matmul_bn(x2d, w2d, bias, *, relu, residual=None,
                    out_dtype=jnp.bfloat16):
    """out = relu?( x2d @ w2d + bias (+ residual) ).

    x2d/w2d are consumed as bf16 (MXU native), accumulation is f32, output is
    `out_dtype`.  BN scale is expected to be pre-folded into w2d; `bias` is the
    folded BN bias.  Tiled over (M, N, K) with K as the reduction axis.
    """
    M, K = x2d.shape
    K2, N = w2d.shape
    assert K == K2

    tm = _tile(M, TM_TARGET, 8)
    tn = _tile(N, TN_TARGET, 128)
    tk = _tile(K, TK_TARGET, 128)
    grid = (M // tm, N // tn, K // tk)

    x2d = x2d.astype(jnp.bfloat16)
    w2d = w2d.astype(jnp.bfloat16)
    bias2d = bias.reshape(1, N).astype(jnp.float32)

    in_specs = [
        pl.BlockSpec((tm, tk), lambda i, j, k: (i, k)),   # activations
        pl.BlockSpec((tk, tn), lambda i, j, k: (k, j)),   # folded weights
        pl.BlockSpec((1, tn), lambda i, j, k: (0, j)),    # folded BN bias
    ]
    args = [x2d, w2d, bias2d]

    if residual is None:
        kernel = functools.partial(_matmul_bias_kernel, relu=relu)
    else:
        kernel = functools.partial(_matmul_bias_res_kernel, relu=relu)
        in_specs.append(pl.BlockSpec((tm, tn), lambda i, j, k: (i, j)))
        args.append(residual.astype(jnp.bfloat16))

    return pl.pallas_call(
        kernel,
        out_shape=jax.ShapeDtypeStruct((M, N), out_dtype),
        grid_spec=pltpu.PrefetchScalarGridSpec(
            num_scalar_prefetch=0,
            grid=grid,
            in_specs=in_specs,
            out_specs=pl.BlockSpec((tm, tn), lambda i, j, k: (i, j)),
            scratch_shapes=[pltpu.VMEM((tm, tn), jnp.float32)],
        ),
        compiler_params=pltpu.CompilerParams(
            dimension_semantics=("parallel", "parallel", "arbitrary"),
            vmem_limit_bytes=VMEM_LIMIT_BYTES,
        ),
    )(*args)


# ------------------------------- JAX glue ----------------------------------

def im2col_3x3(x, stride):
    """x: (N,H,W,C) NHWC, 3x3 window, pad=1 -> (N*Ho*Wo, 9*C), Ho, Wo."""
    # TODO(synk): fuse the 3x3 patch extraction into the conv2 kernel (9
    # shifted matmuls accumulating in VMEM) to avoid the 9x HBM blow-up.
    N, H, W, C = x.shape
    xp = jnp.pad(x, ((0, 0), (1, 1), (1, 1), (0, 0)))
    Ho = (H + 2 - 3) // stride + 1
    Wo = (W + 2 - 3) // stride + 1
    cols = []
    for dh in range(3):
        for dw in range(3):
            cols.append(xp[:, dh:dh + stride * Ho:stride,
                           dw:dw + stride * Wo:stride, :])
    patches = jnp.concatenate(cols, axis=-1)  # (N, Ho, Wo, 9*C)
    return patches.reshape(N * Ho * Wo, 9 * C), Ho, Wo


# --------------------------- parameter creation -----------------------------

def _bn_fold(key, c):
    k1, k2, k3, k4 = jax.random.split(key, 4)
    gamma = 1.0 + 0.1 * jax.random.normal(k1, (c,), jnp.float32)
    beta = 0.1 * jax.random.normal(k2, (c,), jnp.float32)
    mean = 0.1 * jax.random.normal(k3, (c,), jnp.float32)
    var = jnp.abs(jax.random.normal(k4, (c,), jnp.float32)) + 0.5
    scale = gamma / jnp.sqrt(var + EPS)
    bias = beta - mean * scale
    return scale, bias


def _conv_w(key, kh, kw, cin, cout):
    std = (2.0 / (kh * kw * cin)) ** 0.5
    return std * jax.random.normal(key, (kh, kw, cin, cout), jnp.float32)


def make_bottleneck_params(key, inplanes, planes, downsample):
    out_c = planes * 4
    keys = jax.random.split(key, 8)
    p = {
        'w1': _conv_w(keys[0], 1, 1, inplanes, planes),
        'w2': _conv_w(keys[1], 3, 3, planes, planes),
        'w3': _conv_w(keys[2], 1, 1, planes, out_c),
    }
    p['s1'], p['b1'] = _bn_fold(keys[3], planes)
    p['s2'], p['b2'] = _bn_fold(keys[4], planes)
    p['s3'], p['b3'] = _bn_fold(keys[5], out_c)
    if downsample:
        p['wd'] = _conv_w(keys[6], 1, 1, inplanes, out_c)
        p['sd'], p['bd'] = _bn_fold(keys[7], out_c)
    return p


def make_layer4_params(key, inplanes, planes):
    k0, k1, k2 = jax.random.split(key, 3)
    return [
        make_bottleneck_params(k0, inplanes, planes, downsample=True),   # stride 2
        make_bottleneck_params(k1, planes * 4, planes, downsample=False),
        make_bottleneck_params(k2, planes * 4, planes, downsample=False),
    ]


def fold_block(p):
    """Fold eval-mode BN scale into conv weights (bf16), keep bias in f32."""
    f = {
        'w1': (p['w1'] * p['s1']).astype(jnp.bfloat16),
        'b1': p['b1'].astype(jnp.float32),
        'w2': (p['w2'] * p['s2']).astype(jnp.bfloat16),
        'b2': p['b2'].astype(jnp.float32),
        'w3': (p['w3'] * p['s3']).astype(jnp.bfloat16),
        'b3': p['b3'].astype(jnp.float32),
    }
    if 'wd' in p:
        f['wd'] = (p['wd'] * p['sd']).astype(jnp.bfloat16)
        f['bd'] = p['bd'].astype(jnp.float32)
    return f


# ------------------------------ forward pass --------------------------------

def bottleneck_pallas(x, fp, stride):
    """x: (N,H,W,C) NHWC bf16, fp: folded params."""
    # TODO(synk): fuse the whole bottleneck (conv1/conv2/conv3/downsample) into
    # one pallas_call per M-tile to keep intermediates in VMEM.
    N, H, W, C = x.shape
    planes = fp['w1'].shape[-1]
    out_c = fp['w3'].shape[-1]

    # conv1 1x1 + folded-bn1 + relu
    y = fused_matmul_bn(x.reshape(N * H * W, C),
                        fp['w1'].reshape(C, planes), fp['b1'], relu=True)
    y = y.reshape(N, H, W, planes)

    # conv2 3x3 (stride, pad=1) + folded-bn2 + relu
    cols, Ho, Wo = im2col_3x3(y, stride)
    y = fused_matmul_bn(cols, fp['w2'].reshape(9 * planes, planes),
                        fp['b2'], relu=True)

    # residual branch
    if 'wd' in fp:
        # TODO(synk): express the stride-2 sampling as a strided DMA inside the
        # downsample kernel instead of this host-side gather.
        xs = x[:, ::stride, ::stride, :].reshape(N * Ho * Wo, C)
        res = fused_matmul_bn(xs, fp['wd'].reshape(C, out_c), fp['bd'],
                              relu=False)
    else:
        res = x.reshape(N * H * W, C)

    # conv3 1x1 + folded-bn3 + residual add + relu (fused)
    y = fused_matmul_bn(y, fp['w3'].reshape(planes, out_c), fp['b3'],
                        relu=True, residual=res)
    return y.reshape(N, Ho, Wo, out_c)


def resnet_deep_branch_forward(x_nchw, params):
    fps = [fold_block(p) for p in params]
    x = jnp.transpose(x_nchw, (0, 2, 3, 1)).astype(jnp.bfloat16)  # NCHW->NHWC
    x = bottleneck_pallas(x, fps[0], stride=2)
    x = bottleneck_pallas(x, fps[1], stride=1)
    x = bottleneck_pallas(x, fps[2], stride=1)
    return jnp.transpose(x, (0, 3, 1, 2)).astype(jnp.float32)     # NHWC->NCHW


# ----------------------- pure-JAX reference (check) -------------------------
# Mirrors the bf16-in / f32-accumulate / bf16-out numerics of the Pallas path.

def _conv_ref(x, w, stride, padding):
    return jax.lax.conv_general_dilated(
        x.astype(jnp.bfloat16), w.astype(jnp.bfloat16),
        window_strides=(stride, stride), padding=padding,
        dimension_numbers=('NHWC', 'HWIO', 'NHWC'),
        preferred_element_type=jnp.float32)


def bottleneck_ref(x, fp, stride):
    y = jnp.maximum(_conv_ref(x, fp['w1'], 1, 'VALID') + fp['b1'], 0.0)
    y = y.astype(jnp.bfloat16)
    y = jnp.maximum(_conv_ref(y, fp['w2'], stride, [(1, 1), (1, 1)]) + fp['b2'],
                    0.0)
    y = y.astype(jnp.bfloat16)
    if 'wd' in fp:
        r = (_conv_ref(x, fp['wd'], stride, 'VALID') + fp['bd'])
        r = r.astype(jnp.bfloat16)
    else:
        r = x
    y = _conv_ref(y, fp['w3'], 1, 'VALID') + fp['b3'] + r.astype(jnp.float32)
    return jnp.maximum(y, 0.0).astype(jnp.bfloat16)


def resnet_deep_branch_ref(x_nchw, params):
    fps = [fold_block(p) for p in params]
    x = jnp.transpose(x_nchw, (0, 2, 3, 1)).astype(jnp.bfloat16)
    x = bottleneck_ref(x, fps[0], 2)
    x = bottleneck_ref(x, fps[1], 1)
    x = bottleneck_ref(x, fps[2], 1)
    return jnp.transpose(x, (0, 3, 1, 2)).astype(jnp.float32)


# ---------------------------------- main ------------------------------------

if __name__ == "__main__":
    # Scaled-down layer4: real layer4 is (1024 -> 512 -> 2048); here 64 -> 32 -> 128.
    INPLANES, PLANES = 64, 32
    key = jax.random.PRNGKey(0)
    kx, kp = jax.random.split(key)

    x = jax.random.normal(kx, (2, INPLANES, 8, 8), jnp.float32)  # NCHW like PyTorch
    params = make_layer4_params(kp, INPLANES, PLANES)

    out = jax.jit(resnet_deep_branch_forward)(x, params)
    out = jax.block_until_ready(out)

    ref = resnet_deep_branch_ref(x, params)
    assert out.shape == (2, PLANES * 4, 4, 4), out.shape
    assert jnp.allclose(out, ref, atol=3e-2, rtol=3e-2), "mismatch vs reference"

    # TODO(synk): train-mode BatchNorm (batch statistics) not implemented; BN is
    # folded in eval mode, matching the typical inference use of layer4.
    print("KERNEL_OK")
</pallas_src>

<mosaic_0001>
module attributes {stable_mosaic.version = 11 : i64} {
  func.func @_matmul_bias_kernel(%arg0: i32, %arg1: i32, %arg2: i32, %arg3: memref<128x64xbf16, #tpu.memory_space<vmem>>, %arg4: memref<64x32xbf16, #tpu.memory_space<vmem>>, %arg5: memref<1x32xf32, #tpu.memory_space<vmem>>, %arg6: memref<128x32xbf16, #tpu.memory_space<vmem>>, %arg7: memref<128x32xf32, #tpu.memory_space<vmem>>) attributes {dimension_semantics = [#tpu.dimension_semantics<parallel>, #tpu.dimension_semantics<parallel>, #tpu.dimension_semantics<arbitrary>], iteration_bounds = array<i64: 1, 1, 1>, scalar_prefetch = 0 : i64, scratch_operands = 1 : i64, tpu.core_type = #tpu.core_type<tc>, window_params = [{transform_indices = @transform_0, window_bounds = array<i64: 128, 64>}, {transform_indices = @transform_1, window_bounds = array<i64: 64, 32>}, {transform_indices = @transform_2, window_bounds = array<i64: 1, 32>}, {transform_indices = @transform_3, window_bounds = array<i64: 128, 32>}]} {
    %c0_i32 = arith.constant 0 : i32
    %0 = arith.cmpi eq, %arg2, %c0_i32 : i32
    %1 = arith.extui %0 : i1 to i32
    %c0_i32_0 = arith.constant 0 : i32
    %2 = arith.cmpi ne, %1, %c0_i32_0 : i32
    scf.if %2 {
      %cst_10 = arith.constant 0.000000e+00 : f32
      %12 = vector.broadcast %cst_10 : f32 to vector<128x32xf32>
      %c0_11 = arith.constant 0 : index
      %c0_12 = arith.constant 0 : index
      %13 = vector.load %arg7[%c0_11, %c0_12] : memref<128x32xf32, #tpu.memory_space<vmem>>, vector<128x32xf32>
      tpu.vector_store %arg7[%c0_11, %c0_12], %12 {strides = array<i32>} : memref<128x32xf32, #tpu.memory_space<vmem>>, vector<128x32xf32>,
    } else {
    }
    %c0 = arith.constant 0 : index
    %c0_1 = arith.constant 0 : index
    %3 = vector.load %arg7[%c0, %c0_1] : memref<128x32xf32, #tpu.memory_space<vmem>>, vector<128x32xf32>
    %c0_2 = arith.constant 0 : index
    %c0_3 = arith.constant 0 : index
    %4 = vector.load %arg3[%c0_2, %c0_3] : memref<128x64xbf16, #tpu.memory_space<vmem>>, vector<128x64xbf16>
    %c0_4 = arith.constant 0 : index
    %c0_5 = arith.constant 0 : index
    %5 = vector.load %arg4[%c0_4, %c0_5] : memref<64x32xbf16, #tpu.memory_space<vmem>>, vector<64x32xbf16>
    %cst = arith.constant dense<0.000000e+00> : vector<128x32xf32>
    %6 = tpu.matmul %4, %5, %cst {dimension_numbers = #tpu.dot_dimension_numbers<[1], [0], [0], [1], [0, 0, 1, 1], [], []>} : vector<128x64xbf16>, vector<64x32xbf16>, vector<128x32xf32> -> vector<128x32xf32>
    %7 = arith.addf %3, %6 : vector<128x32xf32>
    %c0_6 = arith.constant 0 : index
    %c0_7 = arith.constant 0 : index
    %8 = vector.load %arg7[%c0_6, %c0_7] : memref<128x32xf32, #tpu.memory_space<vmem>>, vector<128x32xf32>
    tpu.vector_store %arg7[%c0_6, %c0_7], %7 {strides = array<i32>} : memref<128x32xf32, #tpu.memory_space<vmem>>, vector<128x32xf32>,
    %c0_i32_8 = arith.constant 0 : i32
    %9 = arith.cmpi eq, %arg2, %c0_i32_8 : i32
    %10 = arith.extui %9 : i1 to i32
    %c0_i32_9 = arith.constant 0 : i32
    %11 = arith.cmpi ne, %10, %c0_i32_9 : i32
    scf.if %11 {
      %c0_10 = arith.constant 0 : index
      %c0_11 = arith.constant 0 : index
      %12 = vector.load %arg7[%c0_10, %c0_11] : memref<128x32xf32, #tpu.memory_space<vmem>>, vector<128x32xf32>
      %c0_12 = arith.constant 0 : index
      %c0_13 = arith.constant 0 : index
      %13 = vector.load %arg5[%c0_12, %c0_13] : memref<1x32xf32, #tpu.memory_space<vmem>>, vector<1x32xf32>
      %14 = vector.broadcast %13 : vector<1x32xf32> to vector<128x32xf32>
      %15 = arith.addf %12, %14 : vector<128x32xf32>
      %cst_14 = arith.constant 0.000000e+00 : f32
      %16 = vector.broadcast %cst_14 : f32 to vector<128x32xf32>
      %17 = arith.maximumf %15, %16 : vector<128x32xf32>
      %18 = arith.truncf %17 : vector<128x32xf32> to vector<128x32xbf16>
      %c0_15 = arith.constant 0 : index
      %c0_16 = arith.constant 0 : index
      %19 = vector.load %arg6[%c0_15, %c0_16] : memref<128x32xbf16, #tpu.memory_space<vmem>>, vector<128x32xbf16>
      tpu.vector_store %arg6[%c0_15, %c0_16], %18 {strides = array<i32>} : memref<128x32xbf16, #tpu.memory_space<vmem>>, vector<128x32xbf16>,
    } else {
    }
    return
  }
  func.func @transform_0(%arg0: i32, %arg1: i32, %arg2: i32) -> (i32, i32) {
    %c0_i32 = arith.constant 0 : i32
    return %arg0, %arg2 : i32, i32
  }
  func.func @transform_1(%arg0: i32, %arg1: i32, %arg2: i32) -> (i32, i32) {
    %c0_i32 = arith.constant 0 : i32
    return %arg2, %arg1 : i32, i32
  }
  func.func @transform_2(%arg0: i32, %arg1: i32, %arg2: i32) -> (i32, i32) {
    %c0_i32 = arith.constant 0 : i32
    %c0_i32_0 = arith.constant 0 : i32
    return %c0_i32, %arg1 : i32, i32
  }
  func.func @transform_3(%arg0: i32, %arg1: i32, %arg2: i32) -> (i32, i32) {
    %c0_i32 = arith.constant 0 : i32
    return %arg0, %arg1 : i32, i32
  }
}

module attributes {stable_mosaic.version = 11 : i64} {
  func.func @_matmul_bias_kernel(%arg0: i32, %arg1: i32, %arg2: i32, %arg3: memref<32x288xbf16, #tpu.memory_space<vmem>>, %arg4: memref<288x32xbf16, #tpu.memory_space<vmem>>, %arg5: memref<1x32xf32, #tpu.memory_space<vmem>>, %arg6: memref<32x32xbf16, #tpu.memory_space<vmem>>, %arg7: memref<32x32xf32, #tpu.memory_space<vmem>>) attributes {dimension_semantics = [#tpu.dimension_semantics<parallel>, #tpu.dimension_semantics<parallel>, #tpu.dimension_semantics<arbitrary>], iteration_bounds = array<i64: 1, 1, 1>, scalar_prefetch = 0 : i64, scratch_operands = 1 : i64, tpu.core_type = #tpu.core_type<tc>, window_params = [{transform_indices = @transform_0, window_bounds = array<i64: 32, 288>}, {transform_indices = @transform_1, window_bounds = array<i64: 288, 32>}, {transform_indices = @transform_2, window_bounds = array<i64: 1, 32>}, {transform_indices = @transform_3, window_bounds = array<i64: 32, 32>}]} {
    %c0_i32 = arith.constant 0 : i32
    %0 = arith.cmpi eq, %arg2, %c0_i32 : i32
    %1 = arith.extui %0 : i1 to i32
    %c0_i32_0 = arith.constant 0 : i32
    %2 = arith.cmpi ne, %1, %c0_i32_0 : i32
    scf.if %2 {
      %cst_10 = arith.constant 0.000000e+00 : f32
      %12 = vector.broadcast %cst_10 : f32 to vector<32x32xf32>
      %c0_11 = arith.constant 0 : index
      %c0_12 = arith.constant 0 : index
      %13 = vector.load %arg7[%c0_11, %c0_12] : memref<32x32xf32, #tpu.memory_space<vmem>>, vector<32x32xf32>
      tpu.vector_store %arg7[%c0_11, %c0_12], %12 {strides = array<i32>} : memref<32x32xf32, #tpu.memory_space<vmem>>, vector<32x32xf32>,
    } else {
    }
    %c0 = arith.constant 0 : index
    %c0_1 = arith.constant 0 : index
    %3 = vector.load %arg7[%c0, %c0_1] : memref<32x32xf32, #tpu.memory_space<vmem>>, vector<32x32xf32>
    %c0_2 = arith.constant 0 : index
    %c0_3 = arith.constant 0 : index
    %4 = vector.load %arg3[%c0_2, %c0_3] : memref<32x288xbf16, #tpu.memory_space<vmem>>, vector<32x288xbf16>
    %c0_4 = arith.constant 0 : index
    %c0_5 = arith.constant 0 : index
    %5 = vector.load %arg4[%c0_4, %c0_5] : memref<288x32xbf16, #tpu.memory_space<vmem>>, vector<288x32xbf16>
    %cst = arith.constant dense<0.000000e+00> : vector<32x32xf32>
    %6 = tpu.matmul %4, %5, %cst {dimension_numbers = #tpu.dot_dimension_numbers<[1], [0], [0], [1], [0, 0, 1, 1], [], []>} : vector<32x288xbf16>, vector<288x32xbf16>, vector<32x32xf32> -> vector<32x32xf32>
    %7 = arith.addf %3, %6 : vector<32x32xf32>
    %c0_6 = arith.constant 0 : index
    %c0_7 = arith.constant 0 : index
    %8 = vector.load %arg7[%c0_6, %c0_7] : memref<32x32xf32, #tpu.memory_space<vmem>>, vector<32x32xf32>
    tpu.vector_store %arg7[%c0_6, %c0_7], %7 {strides = array<i32>} : memref<32x32xf32, #tpu.memory_space<vmem>>, vector<32x32xf32>,
    %c0_i32_8 = arith.constant 0 : i32
    %9 = arith.cmpi eq, %arg2, %c0_i32_8 : i32
    %10 = arith.extui %9 : i1 to i32
    %c0_i32_9 = arith.constant 0 : i32
    %11 = arith.cmpi ne, %10, %c0_i32_9 : i32
    scf.if %11 {
      %c0_10 = arith.constant 0 : index
      %c0_11 = arith.constant 0 : index
      %12 = vector.load %arg7[%c0_10, %c0_11] : memref<32x32xf32, #tpu.memory_space<vmem>>, vector<32x32xf32>
      %c0_12 = arith.constant 0 : index
      %c0_13 = arith.constant 0 : index
      %13 = vector.load %arg5[%c0_12, %c0_13] : memref<1x32xf32, #tpu.memory_space<vmem>>, vector<1x32xf32>
      %14 = vector.broadcast %13 : vector<1x32xf32> to vector<32x32xf32>
      %15 = arith.addf %12, %14 : vector<32x32xf32>
      %cst_14 = arith.constant 0.000000e+00 : f32
      %16 = vector.broadcast %cst_14 : f32 to vector<32x32xf32>
      %17 = arith.maximumf %15, %16 : vector<32x32xf32>
      %18 = arith.truncf %17 : vector<32x32xf32> to vector<32x32xbf16>
      %c0_15 = arith.constant 0 : index
      %c0_16 = arith.constant 0 : index
      %19 = vector.load %arg6[%c0_15, %c0_16] : memref<32x32xbf16, #tpu.memory_space<vmem>>, vector<32x32xbf16>
      tpu.vector_store %arg6[%c0_15, %c0_16], %18 {strides = array<i32>} : memref<32x32xbf16, #tpu.memory_space<vmem>>, vector<32x32xbf16>,
    } else {
    }
    return
  }
  func.func @transform_0(%arg0: i32, %arg1: i32, %arg2: i32) -> (i32, i32) {
    %c0_i32 = arith.constant 0 : i32
    return %arg0, %arg2 : i32, i32
  }
  func.func @transform_1(%arg0: i32, %arg1: i32, %arg2: i32) -> (i32, i32) {
    %c0_i32 = arith.constant 0 : i32
    return %arg2, %arg1 : i32, i32
  }
  func.func @transform_2(%arg0: i32, %arg1: i32, %arg2: i32) -> (i32, i32) {
    %c0_i32 = arith.constant 0 : i32
    %c0_i32_0 = arith.constant 0 : i32
    return %c0_i32, %arg1 : i32, i32
  }
  func.func @transform_3(%arg0: i32, %arg1: i32, %arg2: i32) -> (i32, i32) {
    %c0_i32 = arith.constant 0 : i32
    return %arg0, %arg1 : i32, i32
  }
}

module attributes {stable_mosaic.version = 11 : i64} {
  func.func @_matmul_bias_res_kernel(%arg0: i32, %arg1: i32, %arg2: i32, %arg3: memref<32x32xbf16, #tpu.memory_space<vmem>>, %arg4: memref<32x128xbf16, #tpu.memory_space<vmem>>, %arg5: memref<1x128xf32, #tpu.memory_space<vmem>>, %arg6: memref<32x128xbf16, #tpu.memory_space<vmem>>, %arg7: memref<32x128xbf16, #tpu.memory_space<vmem>>, %arg8: memref<32x128xf32, #tpu.memory_space<vmem>>) attributes {dimension_semantics = [#tpu.dimension_semantics<parallel>, #tpu.dimension_semantics<parallel>, #tpu.dimension_semantics<arbitrary>], iteration_bounds = array<i64: 1, 1, 1>, scalar_prefetch = 0 : i64, scratch_operands = 1 : i64, tpu.core_type = #tpu.core_type<tc>, window_params = [{transform_indices = @transform_0, window_bounds = array<i64: 32, 32>}, {transform_indices = @transform_1, window_bounds = array<i64: 32, 128>}, {transform_indices = @transform_2, window_bounds = array<i64: 1, 128>}, {transform_indices = @transform_3, window_bounds = array<i64: 32, 128>}, {transform_indices = @transform_4, window_bounds = array<i64: 32, 128>}]} {
    %c0_i32 = arith.constant 0 : i32
    %0 = arith.cmpi eq, %arg2, %c0_i32 : i32
    %1 = arith.extui %0 : i1 to i32
    %c0_i32_0 = arith.constant 0 : i32
    %2 = arith.cmpi ne, %1, %c0_i32_0 : i32
    scf.if %2 {
      %cst_10 = arith.constant 0.000000e+00 : f32
      %12 = vector.broadcast %cst_10 : f32 to vector<32x128xf32>
      %c0_11 = arith.constant 0 : index
      %c0_12 = arith.constant 0 : index
      %13 = vector.load %arg8[%c0_11, %c0_12] : memref<32x128xf32, #tpu.memory_space<vmem>>, vector<32x128xf32>
      tpu.vector_store %arg8[%c0_11, %c0_12], %12 {strides = array<i32>} : memref<32x128xf32, #tpu.memory_space<vmem>>, vector<32x128xf32>,
    } else {
    }
    %c0 = arith.constant 0 : index
    %c0_1 = arith.constant 0 : index
    %3 = vector.load %arg8[%c0, %c0_1] : memref<32x128xf32, #tpu.memory_space<vmem>>, vector<32x128xf32>
    %c0_2 = arith.constant 0 : index
    %c0_3 = arith.constant 0 : index
    %4 = vector.load %arg3[%c0_2, %c0_3] : memref<32x32xbf16, #tpu.memory_space<vmem>>, vector<32x32xbf16>
    %c0_4 = arith.constant 0 : index
    %c0_5 = arith.constant 0 : index
    %5 = vector.load %arg4[%c0_4, %c0_5] : memref<32x128xbf16, #tpu.memory_space<vmem>>, vector<32x128xbf16>
    %cst = arith.constant dense<0.000000e+00> : vector<32x128xf32>
    %6 = tpu.matmul %4, %5, %cst {dimension_numbers = #tpu.dot_dimension_numbers<[1], [0], [0], [1], [0, 0, 1, 1], [], []>} : vector<32x32xbf16>, vector<32x128xbf16>, vector<32x128xf32> -> vector<32x128xf32>
    %7 = arith.addf %3, %6 : vector<32x128xf32>
    %c0_6 = arith.constant 0 : index
    %c0_7 = arith.constant 0 : index
    %8 = vector.load %arg8[%c0_6, %c0_7] : memref<32x128xf32, #tpu.memory_space<vmem>>, vector<32x128xf32>
    tpu.vector_store %arg8[%c0_6, %c0_7], %7 {strides = array<i32>} : memref<32x128xf32, #tpu.memory_space<vmem>>, vector<32x128xf32>,
    %c0_i32_8 = arith.constant 0 : i32
    %9 = arith.cmpi eq, %arg2, %c0_i32_8 : i32
    %10 = arith.extui %9 : i1 to i32
    %c0_i32_9 = arith.constant 0 : i32
    %11 = arith.cmpi ne, %10, %c0_i32_9 : i32
    scf.if %11 {
      %c0_10 = arith.constant 0 : index
      %c0_11 = arith.constant 0 : index
      %12 = vector.load %arg8[%c0_10, %c0_11] : memref<32x128xf32, #tpu.memory_space<vmem>>, vector<32x128xf32>
      %c0_12 = arith.constant 0 : index
      %c0_13 = arith.constant 0 : index
      %13 = vector.load %arg5[%c0_12, %c0_13] : memref<1x128xf32, #tpu.memory_space<vmem>>, vector<1x128xf32>
      %14 = vector.broadcast %13 : vector<1x128xf32> to vector<32x128xf32>
      %15 = arith.addf %12, %14 : vector<32x128xf32>
      %c0_14 = arith.constant 0 : index
      %c0_15 = arith.constant 0 : index
      %16 = vector.load %arg6[%c0_14, %c0_15] : memref<32x128xbf16, #tpu.memory_space<vmem>>, vector<32x128xbf16>
      %17 = arith.extf %16 : vector<32x128xbf16> to vector<32x128xf32>
      %18 = arith.addf %15, %17 : vector<32x128xf32>
      %cst_16 = arith.constant 0.000000e+00 : f32
      %19 = vector.broadcast %cst_16 : f32 to vector<32x128xf32>
      %20 = arith.maximumf %18, %19 : vector<32x128xf32>
      %21 = arith.truncf %20 : vector<32x128xf32> to vector<32x128xbf16>
      %c0_17 = arith.constant 0 : index
      %c0_18 = arith.constant 0 : index
      %22 = vector.load %arg7[%c0_17, %c0_18] : memref<32x128xbf16, #tpu.memory_space<vmem>>, vector<32x128xbf16>
      tpu.vector_store %arg7[%c0_17, %c0_18], %21 {strides = array<i32>} : memref<32x128xbf16, #tpu.memory_space<vmem>>, vector<32x128xbf16>,
    } else {
    }
    return
  }
  func.func @transform_0(%arg0: i32, %arg1: i32, %arg2: i32) -> (i32, i32) {
    %c0_i32 = arith.constant 0 : i32
    return %arg0, %arg2 : i32, i32
  }
  func.func @transform_1(%arg0: i32, %arg1: i32, %arg2: i32) -> (i32, i32) {
    %c0_i32 = arith.constant 0 : i32
    return %arg2, %arg1 : i32, i32
  }
  func.func @transform_2(%arg0: i32, %arg1: i32, %arg2: i32) -> (i32, i32) {
    %c0_i32 = arith.constant 0 : i32
    %c0_i32_0 = arith.constant 0 : i32
    return %c0_i32, %arg1 : i32, i32
  }
  func.func @transform_3(%arg0: i32, %arg1: i32, %arg2: i32) -> (i32, i32) {
    %c0_i32 = arith.constant 0 : i32
    return %arg0, %arg1 : i32, i32
  }
  func.func @transform_4(%arg0: i32, %arg1: i32, %arg2: i32) -> (i32, i32) {
    %c0_i32 = arith.constant 0 : i32
    return %arg0, %arg1 : i32, i32
  }
}

module attributes {stable_mosaic.version = 11 : i64} {
  func.func @_matmul_bias_kernel(%arg0: i32, %arg1: i32, %arg2: i32, %arg3: memref<32x64xbf16, #tpu.memory_space<vmem>>, %arg4: memref<64x128xbf16, #tpu.memory_space<vmem>>, %arg5: memref<1x128xf32, #tpu.memory_space<vmem>>, %arg6: memref<32x128xbf16, #tpu.memory_space<vmem>>, %arg7: memref<32x128xf32, #tpu.memory_space<vmem>>) attributes {dimension_semantics = [#tpu.dimension_semantics<parallel>, #tpu.dimension_semantics<parallel>, #tpu.dimension_semantics<arbitrary>], iteration_bounds = array<i64: 1, 1, 1>, scalar_prefetch = 0 : i64, scratch_operands = 1 : i64, tpu.core_type = #tpu.core_type<tc>, window_params = [{transform_indices = @transform_0, window_bounds = array<i64: 32, 64>}, {transform_indices = @transform_1, window_bounds = array<i64: 64, 128>}, {transform_indices = @transform_2, window_bounds = array<i64: 1, 128>}, {transform_indices = @transform_3, window_bounds = array<i64: 32, 128>}]} {
    %c0_i32 = arith.constant 0 : i32
    %0 = arith.cmpi eq, %arg2, %c0_i32 : i32
    %1 = arith.extui %0 : i1 to i32
    %c0_i32_0 = arith.constant 0 : i32
    %2 = arith.cmpi ne, %1, %c0_i32_0 : i32
    scf.if %2 {
      %cst_10 = arith.constant 0.000000e+00 : f32
      %12 = vector.broadcast %cst_10 : f32 to vector<32x128xf32>
      %c0_11 = arith.constant 0 : index
      %c0_12 = arith.constant 0 : index
      %13 = vector.load %arg7[%c0_11, %c0_12] : memref<32x128xf32, #tpu.memory_space<vmem>>, vector<32x128xf32>
      tpu.vector_store %arg7[%c0_11, %c0_12], %12 {strides = array<i32>} : memref<32x128xf32, #tpu.memory_space<vmem>>, vector<32x128xf32>,
    } else {
    }
    %c0 = arith.constant 0 : index
    %c0_1 = arith.constant 0 : index
    %3 = vector.load %arg7[%c0, %c0_1] : memref<32x128xf32, #tpu.memory_space<vmem>>, vector<32x128xf32>
    %c0_2 = arith.constant 0 : index
    %c0_3 = arith.constant 0 : index
    %4 = vector.load %arg3[%c0_2, %c0_3] : memref<32x64xbf16, #tpu.memory_space<vmem>>, vector<32x64xbf16>
    %c0_4 = arith.constant 0 : index
    %c0_5 = arith.constant 0 : index
    %5 = vector.load %arg4[%c0_4, %c0_5] : memref<64x128xbf16, #tpu.memory_space<vmem>>, vector<64x128xbf16>
    %cst = arith.constant dense<0.000000e+00> : vector<32x128xf32>
    %6 = tpu.matmul %4, %5, %cst {dimension_numbers = #tpu.dot_dimension_numbers<[1], [0], [0], [1], [0, 0, 1, 1], [], []>} : vector<32x64xbf16>, vector<64x128xbf16>, vector<32x128xf32> -> vector<32x128xf32>
    %7 = arith.addf %3, %6 : vector<32x128xf32>
    %c0_6 = arith.constant 0 : index
    %c0_7 = arith.constant 0 : index
    %8 = vector.load %arg7[%c0_6, %c0_7] : memref<32x128xf32, #tpu.memory_space<vmem>>, vector<32x128xf32>
    tpu.vector_store %arg7[%c0_6, %c0_7], %7 {strides = array<i32>} : memref<32x128xf32, #tpu.memory_space<vmem>>, vector<32x128xf32>,
    %c0_i32_8 = arith.constant 0 : i32
    %9 = arith.cmpi eq, %arg2, %c0_i32_8 : i32
    %10 = arith.extui %9 : i1 to i32
    %c0_i32_9 = arith.constant 0 : i32
    %11 = arith.cmpi ne, %10, %c0_i32_9 : i32
    scf.if %11 {
      %c0_10 = arith.constant 0 : index
      %c0_11 = arith.constant 0 : index
      %12 = vector.load %arg7[%c0_10, %c0_11] : memref<32x128xf32, #tpu.memory_space<vmem>>, vector<32x128xf32>
      %c0_12 = arith.constant 0 : index
      %c0_13 = arith.constant 0 : index
      %13 = vector.load %arg5[%c0_12, %c0_13] : memref<1x128xf32, #tpu.memory_space<vmem>>, vector<1x128xf32>
      %14 = vector.broadcast %13 : vector<1x128xf32> to vector<32x128xf32>
      %15 = arith.addf %12, %14 : vector<32x128xf32>
      %16 = arith.truncf %15 : vector<32x128xf32> to vector<32x128xbf16>
      %c0_14 = arith.constant 0 : index
      %c0_15 = arith.constant 0 : index
      %17 = vector.load %arg6[%c0_14, %c0_15] : memref<32x128xbf16, #tpu.memory_space<vmem>>, vector<32x128xbf16>
      tpu.vector_store %arg6[%c0_14, %c0_15], %16 {strides = array<i32>} : memref<32x128xbf16, #tpu.memory_space<vmem>>, vector<32x128xbf16>,
    } else {
    }
    return
  }
  func.func @transform_0(%arg0: i32, %arg1: i32, %arg2: i32) -> (i32, i32) {
    %c0_i32 = arith.constant 0 : i32
    return %arg0, %arg2 : i32, i32
  }
  func.func @transform_1(%arg0: i32, %arg1: i32, %arg2: i32) -> (i32, i32) {
    %c0_i32 = arith.constant 0 : i32
    return %arg2, %arg1 : i32, i32
  }
  func.func @transform_2(%arg0: i32, %arg1: i32, %arg2: i32) -> (i32, i32) {
    %c0_i32 = arith.constant 0 : i32
    %c0_i32_0 = arith.constant 0 : i32
    return %c0_i32, %arg1 : i32, i32
  }
  func.func @transform_3(%arg0: i32, %arg1: i32, %arg2: i32) -> (i32, i32) {
    %c0_i32 = arith.constant 0 : i32
    return %arg0, %arg1 : i32, i32
  }
}

module attributes {stable_mosaic.version = 11 : i64} {
  func.func @_matmul_bias_kernel(%arg0: i32, %arg1: i32, %arg2: i32, %arg3: memref<32x128xbf16, #tpu.memory_space<vmem>>, %arg4: memref<128x32xbf16, #tpu.memory_space<vmem>>, %arg5: memref<1x32xf32, #tpu.memory_space<vmem>>, %arg6: memref<32x32xbf16, #tpu.memory_space<vmem>>, %arg7: memref<32x32xf32, #tpu.memory_space<vmem>>) attributes {dimension_semantics = [#tpu.dimension_semantics<parallel>, #tpu.dimension_semantics<parallel>, #tpu.dimension_semantics<arbitrary>], iteration_bounds = array<i64: 1, 1, 1>, scalar_prefetch = 0 : i64, scratch_operands = 1 : i64, tpu.core_type = #tpu.core_type<tc>, window_params = [{transform_indices = @transform_0, window_bounds = array<i64: 32, 128>}, {transform_indices = @transform_1, window_bounds = array<i64: 128, 32>}, {transform_indices = @transform_2, window_bounds = array<i64: 1, 32>}, {transform_indices = @transform_3, window_bounds = array<i64: 32, 32>}]} {
    %c0_i32 = arith.constant 0 : i32
    %0 = arith.cmpi eq, %arg2, %c0_i32 : i32
    %1 = arith.extui %0 : i1 to i32
    %c0_i32_0 = arith.constant 0 : i32
    %2 = arith.cmpi ne, %1, %c0_i32_0 : i32
    scf.if %2 {
      %cst_10 = arith.constant 0.000000e+00 : f32
      %12 = vector.broadcast %cst_10 : f32 to vector<32x32xf32>
      %c0_11 = arith.constant 0 : index
      %c0_12 = arith.constant 0 : index
      %13 = vector.load %arg7[%c0_11, %c0_12] : memref<32x32xf32, #tpu.memory_space<vmem>>, vector<32x32xf32>
      tpu.vector_store %arg7[%c0_11, %c0_12], %12 {strides = array<i32>} : memref<32x32xf32, #tpu.memory_space<vmem>>, vector<32x32xf32>,
    } else {
    }
    %c0 = arith.constant 0 : index
    %c0_1 = arith.constant 0 : index
    %3 = vector.load %arg7[%c0, %c0_1] : memref<32x32xf32, #tpu.memory_space<vmem>>, vector<32x32xf32>
    %c0_2 = arith.constant 0 : index
    %c0_3 = arith.constant 0 : index
    %4 = vector.load %arg3[%c0_2, %c0_3] : memref<32x128xbf16, #tpu.memory_space<vmem>>, vector<32x128xbf16>
    %c0_4 = arith.constant 0 : index
    %c0_5 = arith.constant 0 : index
    %5 = vector.load %arg4[%c0_4, %c0_5] : memref<128x32xbf16, #tpu.memory_space<vmem>>, vector<128x32xbf16>
    %cst = arith.constant dense<0.000000e+00> : vector<32x32xf32>
    %6 = tpu.matmul %4, %5, %cst {dimension_numbers = #tpu.dot_dimension_numbers<[1], [0], [0], [1], [0, 0, 1, 1], [], []>} : vector<32x128xbf16>, vector<128x32xbf16>, vector<32x32xf32> -> vector<32x32xf32>
    %7 = arith.addf %3, %6 : vector<32x32xf32>
    %c0_6 = arith.constant 0 : index
    %c0_7 = arith.constant 0 : index
    %8 = vector.load %arg7[%c0_6, %c0_7] : memref<32x32xf32, #tpu.memory_space<vmem>>, vector<32x32xf32>
    tpu.vector_store %arg7[%c0_6, %c0_7], %7 {strides = array<i32>} : memref<32x32xf32, #tpu.memory_space<vmem>>, vector<32x32xf32>,
    %c0_i32_8 = arith.constant 0 : i32
    %9 = arith.cmpi eq, %arg2, %c0_i32_8 : i32
    %10 = arith.extui %9 : i1 to i32
    %c0_i32_9 = arith.constant 0 : i32
    %11 = arith.cmpi ne, %10, %c0_i32_9 : i32
    scf.if %11 {
      %c0_10 = arith.constant 0 : index
      %c0_11 = arith.constant 0 : index
      %12 = vector.load %arg7[%c0_10, %c0_11] : memref<32x32xf32, #tpu.memory_space<vmem>>, vector<32x32xf32>
      %c0_12 = arith.constant 0 : index
      %c0_13 = arith.constant 0 : index
      %13 = vector.load %arg5[%c0_12, %c0_13] : memref<1x32xf32, #tpu.memory_space<vmem>>, vector<1x32xf32>
      %14 = vector.broadcast %13 : vector<1x32xf32> to vector<32x32xf32>
      %15 = arith.addf %12, %14 : vector<32x32xf32>
      %cst_14 = arith.constant 0.000000e+00 : f32
      %16 = vector.broadcast %cst_14 : f32 to vector<32x32xf32>
      %17 = arith.maximumf %15, %16 : vector<32x32xf32>
      %18 = arith.truncf %17 : vector<32x32xf32> to vector<32x32xbf16>
      %c0_15 = arith.constant 0 : index
      %c0_16 = arith.constant 0 : index
      %19 = vector.load %arg6[%c0_15, %c0_16] : memref<32x32xbf16, #tpu.memory_space<vmem>>, vector<32x32xbf16>
      tpu.vector_store %arg6[%c0_15, %c0_16], %18 {strides = array<i32>} : memref<32x32xbf16, #tpu.memory_space<vmem>>, vector<32x32xbf16>,
    } else {
    }
    return
  }
  func.func @transform_0(%arg0: i32, %arg1: i32, %arg2: i32) -> (i32, i32) {
    %c0_i32 = arith.constant 0 : i32
    return %arg0, %arg2 : i32, i32
  }
  func.func @transform_1(%arg0: i32, %arg1: i32, %arg2: i32) -> (i32, i32) {
    %c0_i32 = arith.constant 0 : i32
    return %arg2, %arg1 : i32, i32
  }
  func.func @transform_2(%arg0: i32, %arg1: i32, %arg2: i32) -> (i32, i32) {
    %c0_i32 = arith.constant 0 : i32
    %c0_i32_0 = arith.constant 0 : i32
    return %c0_i32, %arg1 : i32, i32
  }
  func.func @transform_3(%arg0: i32, %arg1: i32, %arg2: i32) -> (i32, i32) {
    %c0_i32 = arith.constant 0 : i32
    return %arg0, %arg1 : i32, i32
  }
}

</mosaic_0001>

<bundles_post_ra>
// kernel: resnet_deep_branch_forward.10
= control target key start
LH: loop header
LB: loop body
LE: loop exit
PB: predicated region body
PF: predicated region fallthrough
CT: control target
= control target key end

     0   :  { %vm19_vm0 = vcmask 261120   ;;  %v548_v1 = vmov 0.0   ;;  %vm140_vm1 = vcmask 523264   ;;  %vm417_vm2 = vcmask 257024   ;;  %s730_s1 = inlined_call_operand.vmem [shape: bf16[64,32], index: 1, kind: input, shape index: {}]   ;;  %s731_s0 = inlined_call_operand.vmem [shape: bf16[128,64], index: 0, kind: input, shape index: {}]   ;;  %s732_s2 = inlined_call_operand.vmem [shape: f32[1,32], index: 2, kind: input, shape index: {}]   ;;  %s733_s3 = inlined_call_operand.vmem [shape: bf16[128,32], index: 3, kind: output, shape index: {}]  }
   0x1   :  { %v536_v0 = vld [vmem:[%s730_s1 + $0x18] sm:$0xff]   ;;  %22 = vst.msk [vmem:[#allocation2 + $0x10] sm:$0xff] %vm19_vm0, %v548_v1  ;;  %20 = vst.msk [vmem:[#allocation2] sm:$0xff] %vm19_vm0, %v548_v1  ;;  %v537_v2 = vld [vmem:[%s730_s1 + $0x10] sm:$0xff]  }
   0x2   :  { %21 = vst.msk [vmem:[#allocation2 + $0x8] sm:$0xff] %vm19_vm0, %v548_v1  ;;  %23 = vst.msk [vmem:[#allocation2 + $0x18] sm:$0xff] %vm19_vm0, %v548_v1  ;;  %503 = vmatprep.subr.bf16.mxu0 %v536_v0  ;;  %527 = vmatprep.subr.bf16.mxu1 %v536_v0  ;;  %v538_v3 = vld [vmem:[%s730_s1 + $0x8] sm:$0xff]   ;;  %v540_v4 = vld [vmem:[%s731_s0] sm:$0xff]  }
   0x3   :  { %24 = vst.msk [vmem:[#allocation2 + $0x20] sm:$0xff] %vm19_vm0, %v548_v1  ;;  %25 = vst.msk [vmem:[#allocation2 + $0x28] sm:$0xff] %vm19_vm0, %v548_v1  ;;  %504 = vmatpush3.bf16.msra.mxu0 %v536_v0  ;;  %531 = vmatpush3.bf16.msra.mxu1 %v536_v0  ;;  %v541_v5 = vld [vmem:[%s731_s0 + $0x20] sm:$0xff]   ;;  %v542_v7 = vld [vmem:[%s731_s0 + $0x8] sm:$0xff]  }
   0x4   :  { %26 = vst.msk [vmem:[#allocation2 + $0x30] sm:$0xff] %vm19_vm0, %v548_v1  ;;  %27 = vst.msk [vmem:[#allocation2 + $0x38] sm:$0xff] %vm19_vm0, %v548_v1  ;;  %505 = vmatprep.subr.bf16.mxu0 %v537_v2  ;;  %528 = vmatprep.subr.bf16.mxu1 %v537_v2  ;;  %v539_v6 = vld [vmem:[%s730_s1] sm:$0xff]   ;;  %v543_v8 = vld [vmem:[%s731_s0 + $0x28] sm:$0xff]  }
   0x5   :  { %28 = vst.msk [vmem:[#allocation2 + $0x40] sm:$0xff] %vm19_vm0, %v548_v1  ;;  %29 = vst.msk [vmem:[#allocation2 + $0x48] sm:$0xff] %vm19_vm0, %v548_v1  ;;  %511 = vmatprep.mubr.msk.bf16.mxu0 %vm140_vm1, %v540_v4  ;;  %519 = vmatprep.mubr.msk.bf16.mxu1 %vm140_vm1, %v541_v5  ;;  %v544_v9 = vld [vmem:[%s731_s0 + $0x10] sm:$0xff]   ;;  %v546_v11 = vld [vmem:[%s731_s0 + $0x18] sm:$0xff]  }
   0x6   :  { %30 = vst.msk [vmem:[#allocation2 + $0x50] sm:$0xff] %vm19_vm0, %v548_v1  ;;  %31 = vst.msk [vmem:[#allocation2 + $0x58] sm:$0xff] %vm19_vm0, %v548_v1  ;;  %v545_v10 = vld [vmem:[%s731_s0 + $0x30] sm:$0xff]   ;;  %v547_v12 = vld [vmem:[%s731_s0 + $0x38] sm:$0xff]  }
   0x7   :  { %32 = vst.msk [vmem:[#allocation2 + $0x60] sm:$0xff] %vm19_vm0, %v548_v1  ;;  %33 = vst.msk [vmem:[#allocation2 + $0x68] sm:$0xff] %vm19_vm0, %v548_v1  ;;  %506 = vmatpush3.bf16.msra.mxu0 %v537_v2  ;;  %532 = vmatpush3.bf16.msra.mxu1 %v537_v2  ;;  %v638_v39 = vld [vmem:[%s732_s2] ss:$0 sm:$0xff] }
   0x8   :  { %34 = vst.msk [vmem:[#allocation2 + $0x70] sm:$0xff] %vm19_vm0, %v548_v1  ;;  %35 = vst.msk [vmem:[#allocation2 + $0x78] sm:$0xff] %vm19_vm0, %v548_v1  ;;  %507 = vmatprep.subr.bf16.mxu0 %v538_v3  ;;  %529 = vmatprep.subr.bf16.mxu1 %v538_v3  ;;  %v38_v13 = vld [vmem:[#allocation2 + $0x10] sm:$0xff]  ;;  %v36_v17 = vld [vmem:[#allocation2] sm:$0xff] }
   0x9   :  { %v39_v23 = vld [vmem:[#allocation2 + $0x18] sm:$0xff]  ;;  %v37_v29 = vld [vmem:[#allocation2 + $0x8] sm:$0xff] }
   0xa   :  { %v40_v42 = vld [vmem:[#allocation2 + $0x20] sm:$0xff]  ;;  %v41_v0 = vld [vmem:[#allocation2 + $0x28] sm:$0xff] }
   0xb   :  { %508 = vmatpush3.bf16.msra.mxu0 %v538_v3  ;;  %533 = vmatpush3.bf16.msra.mxu1 %v538_v3  ;;  %v42_v35 = vld [vmem:[#allocation2 + $0x30] sm:$0xff]  ;;  %v43_v54 = vld [vmem:[#allocation2 + $0x38] sm:$0xff] }
   0xc   :  { %509 = vmatprep.subr.bf16.mxu0 %v539_v6  ;;  %530 = vmatprep.subr.bf16.mxu1 %v539_v6  ;;  %v44_v18 = vld [vmem:[#allocation2 + $0x40] sm:$0xff]  ;;  %v45_v30 = vld [vmem:[#allocation2 + $0x48] sm:$0xff] }
   0xd   :  { %v46_v14 = vld [vmem:[#allocation2 + $0x50] sm:$0xff]  ;;  %v47_v24 = vld [vmem:[#allocation2 + $0x58] sm:$0xff] }
   0xe   :  { %v48_v43 = vld [vmem:[#allocation2 + $0x60] sm:$0xff]  ;;  %v49_v1 = vld [vmem:[#allocation2 + $0x68] sm:$0xff] }
   0xf   :  { %510 = vmatpush3.bf16.msra.mxu0 %v539_v6  ;;  %534 = vmatpush3.bf16.msra.mxu1 %v539_v6  ;;  %v50_v36 = vld [vmem:[#allocation2 + $0x70] sm:$0xff]  ;;  %v51_v55 = vld [vmem:[#allocation2 + $0x78] sm:$0xff] }
  0x12   :  { %512 = vmatmul.mubr.msk.bf16.vlgmr.msra.gmra.mxu0 %vm140_vm1, %v542_v7  ;;  %520 = vmatmul.mubr.msk.bf16.vlgmr.msra.gmra.mxu1 %vm140_vm1, %v543_v8 }
  0x13   :  { %515 = vmatprep.mubr.msk.bf16.mxu0 %vm140_vm1, %v544_v9  ;;  %523 = vmatprep.mubr.msk.bf16.mxu1 %vm140_vm1, %v545_v10 }
  0x1a   :  { %516 = vmatmul.mubr.msk.bf16.gmra.mxu0 %vm140_vm1, %v546_v11  ;;  %524 = vmatmul.mubr.msk.bf16.gmra.mxu1 %vm140_vm1, %v547_v12 }
  0xd2   :  { %v513_v15 = vpop.f32.mrf.mxu0  ;;  %v521_v16 = vpop.f32.mrf.mxu1 }
  0xd3   :  { %v264_v19 = vadd.f32 %v513_v15, %v38_v13  ;;  %v272_v20 = vadd.f32 %v521_v16, %v46_v14 }
  0xd4   :  { %v199_v21 = vpop.f32.mrf.mxu0  ;;  %v231_v22 = vpop.f32.mrf.mxu1 }
  0xd5   :  { %281 = vst.msk [vmem:[#allocation2 + $0x10] sm:$0xff] %vm19_vm0, %v264_v19  ;;  %289 = vst.msk [vmem:[#allocation2 + $0x50] sm:$0xff] %vm19_vm0, %v272_v20  ;;  %v262_v25 = vadd.f32 %v199_v21, %v36_v17  ;;  %v270_v26 = vadd.f32 %v231_v22, %v44_v18 }
  0xd6   :  { %v514_v27 = vpop.f32.mrf.mxu0  ;;  %v522_v28 = vpop.f32.mrf.mxu1 }
  0xd7   :  { %279 = vst.msk [vmem:[#allocation2] sm:$0xff] %vm19_vm0, %v262_v25  ;;  %287 = vst.msk [vmem:[#allocation2 + $0x40] sm:$0xff] %vm19_vm0, %v270_v26  ;;  %v265_v31 = vadd.f32 %v514_v27, %v39_v23  ;;  %v273_v32 = vadd.f32 %v522_v28, %v47_v24 }
  0xd8   :  { %v202_v33 = vpop.f32.mrf.mxu0  ;;  %v234_v34 = vpop.f32.mrf.mxu1 }
  0xd9   :  { %282 = vst.msk [vmem:[#allocation2 + $0x18] sm:$0xff] %vm19_vm0, %v265_v31  ;;  %290 = vst.msk [vmem:[#allocation2 + $0x58] sm:$0xff] %vm19_vm0, %v273_v32  ;;  %v263_v37 = vadd.f32 %v202_v33, %v37_v29  ;;  %v271_v38 = vadd.f32 %v234_v34, %v45_v30 }
  0xda   :  { %v517_v40 = vpop.f32.mrf.mxu0  ;;  %v525_v41 = vpop.f32.mrf.mxu1 }
  0xdb   :  { %280 = vst.msk [vmem:[#allocation2 + $0x8] sm:$0xff] %vm19_vm0, %v263_v37  ;;  %288 = vst.msk [vmem:[#allocation2 + $0x48] sm:$0xff] %vm19_vm0, %v271_v38  ;;  %v268_v44 = vadd.f32 %v517_v40, %v42_v35  ;;  %v276_v45 = vadd.f32 %v525_v41, %v50_v36 }
  0xdc   :  { %v300_v46 = vld [vmem:[#allocation2 + $0x10] sm:$0xff]  ;;  %v215_v48 = vpop.f32.mrf.mxu0  ;;  %v247_v49 = vpop.f32.mrf.mxu1 }
  0xdd   :  { %v308_v47 = vld [vmem:[#allocation2 + $0x50] sm:$0xff]  ;;  %v323_v50 = vadd.f32 %v638_v39, %v300_v46  ;;  %285 = vst.msk [vmem:[#allocation2 + $0x30] sm:$0xff] %vm19_vm0, %v268_v44  ;;  %293 = vst.msk [vmem:[#allocation2 + $0x70] sm:$0xff] %vm19_vm0, %v276_v45  ;;  %v266_v52 = vadd.f32 %v215_v48, %v40_v42  ;;  %v274_v53 = vadd.f32 %v247_v49, %v48_v43 }
  0xde   :  { %v331_v51 = vadd.f32 %v638_v39, %v308_v47  ;;  %v298_v56 = vld [vmem:[#allocation2] sm:$0xff]  ;;  %v518_v58 = vpop.f32.mrf.mxu0  ;;  %v526_v59 = vpop.f32.mrf.mxu1 }
  0xdf   :  { %v306_v57 = vld [vmem:[#allocation2 + $0x40] sm:$0xff]  ;;  %v339_v60 = vmax.f32 %v323_v50, 0.0  ;;  %v321_v62 = vadd.f32 %v638_v39, %v298_v56  ;;  %283 = vst.msk [vmem:[#allocation2 + $0x20] sm:$0xff] %vm19_vm0, %v266_v52  ;;  %291 = vst.msk [vmem:[#allocation2 + $0x60] sm:$0xff] %vm19_vm0, %v274_v53  ;;  %v269_v4 = vadd.f32 %v518_v58, %v43_v54  ;;  %v277_v5 = vadd.f32 %v526_v59, %v51_v55 }
  0xe0   :  { %v347_v61 = vmax.f32 %v331_v51, 0.0  ;;  %v329_v63 = vadd.f32 %v638_v39, %v306_v57  ;;  %v301_v2 = vld [vmem:[#allocation2 + $0x18] sm:$0xff]  ;;  %v218_v6 = vpop.f32.mrf.mxu0  ;;  %v250_v7 = vpop.f32.mrf.mxu1 }
  0xe1   :  { %v309_v3 = vld [vmem:[#allocation2 + $0x58] sm:$0xff]  ;;  %v477_v8 = vpack.c.bf16 %v339_v60, %v339_v60  ;;  %v337_v10 = vmax.f32 %v321_v62, 0.0  ;;  %v324_v12 = vadd.f32 %v638_v39, %v301_v2  ;;  %286 = vst.msk [vmem:[#allocation2 + $0x38] sm:$0xff] %vm19_vm0, %v269_v4  ;;  %294 = vst.msk [vmem:[#allocation2 + $0x78] sm:$0xff] %vm19_vm0, %v277_v5  ;;  %v267_v16 = vadd.f32 %v218_v6, %v41_v0 }
  0xe2   :  { %v485_v9 = vpack.c.bf16 %v347_v61, %v347_v61  ;;  %v345_v11 = vmax.f32 %v329_v63, 0.0  ;;  %v332_v13 = vadd.f32 %v638_v39, %v309_v3  ;;  %v299_v14 = vld [vmem:[#allocation2 + $0x8] sm:$0xff]  ;;  %v275_v17 = vadd.f32 %v250_v7, %v49_v1 }
  0xe3   :  { %v307_v15 = vld [vmem:[#allocation2 + $0x48] sm:$0xff]  ;;  %420 = vst.msk [vmem:[%s733_s3 + $0x8] sm:$0xf] %vm417_vm2, %v477_v8  ;;  %v475_v18 = vpack.c.bf16 %v337_v10, %v337_v10  ;;  %v322_v20 = vadd.f32 %v638_v39, %v299_v14  ;;  %v340_v22 = vmax.f32 %v324_v12, 0.0 }
  0xe4   :  { %428 = vst.msk [vmem:[%s733_s3 + $0x28] sm:$0xf] %vm417_vm2, %v485_v9  ;;  %v483_v19 = vpack.c.bf16 %v345_v11, %v345_v11  ;;  %v330_v21 = vadd.f32 %v638_v39, %v307_v15  ;;  %v348_v23 = vmax.f32 %v332_v13, 0.0  ;;  %v304_v24 = vld [vmem:[#allocation2 + $0x30] sm:$0xff] }
  0xe5   :  { %v312_v25 = vld [vmem:[#allocation2 + $0x70] sm:$0xff]  ;;  %284 = vst.msk [vmem:[#allocation2 + $0x28] sm:$0xff] %vm19_vm0, %v267_v16  ;;  %292 = vst.msk [vmem:[#allocation2 + $0x68] sm:$0xff] %vm19_vm0, %v275_v17  ;;  %v338_v26 = vmax.f32 %v322_v20, 0.0  ;;  %v327_v28 = vadd.f32 %v638_v39, %v304_v24  ;;  %v478_v30 = vpack.c.bf16 %v340_v22, %v340_v22 }
  0xe6   :  { %418 = vst.msk [vmem:[%s733_s3] sm:$0xf] %vm417_vm2, %v475_v18  ;;  %426 = vst.msk [vmem:[%s733_s3 + $0x20] sm:$0xf] %vm417_vm2, %v483_v19  ;;  %v346_v27 = vmax.f32 %v330_v21, 0.0  ;;  %v335_v29 = vadd.f32 %v638_v39, %v312_v25  ;;  %v486_v31 = vpack.c.bf16 %v348_v23, %v348_v23  ;;  %v302_v32 = vld [vmem:[#allocation2 + $0x20] sm:$0xff] }
  0xe7   :  { %v310_v33 = vld [vmem:[#allocation2 + $0x60] sm:$0xff]  ;;  %v476_v34 = vpack.c.bf16 %v338_v26, %v338_v26  ;;  %v343_v36 = vmax.f32 %v327_v28, 0.0  ;;  %421 = vst.msk [vmem:[%s733_s3 + $0xc] sm:$0xf] %vm417_vm2, %v478_v30  ;;  %v325_v38 = vadd.f32 %v638_v39, %v302_v32 }
  0xe8   :  { %v484_v35 = vpack.c.bf16 %v346_v27, %v346_v27  ;;  %v351_v37 = vmax.f32 %v335_v29, 0.0  ;;  %429 = vst.msk [vmem:[%s733_s3 + $0x2c] sm:$0xf] %vm417_vm2, %v486_v31  ;;  %v333_v40 = vadd.f32 %v638_v39, %v310_v33  ;;  %v305_v43 = vld [vmem:[#allocation2 + $0x38] sm:$0xff] }
  0xe9   :  { %419 = vst.msk [vmem:[%s733_s3 + $0x4] sm:$0xf] %vm417_vm2, %v476_v34  ;;  %v481_v41 = vpack.c.bf16 %v343_v36, %v343_v36  ;;  %v313_v44 = vld [vmem:[#allocation2 + $0x78] sm:$0xff]  ;;  %v341_v45 = vmax.f32 %v325_v38, 0.0  ;;  %v328_v47 = vadd.f32 %v638_v39, %v305_v43 }
  0xea   :  { %427 = vst.msk [vmem:[%s733_s3 + $0x24] sm:$0xf] %vm417_vm2, %v484_v35  ;;  %v489_v42 = vpack.c.bf16 %v351_v37, %v351_v37  ;;  %v349_v46 = vmax.f32 %v333_v40, 0.0  ;;  %v336_v48 = vadd.f32 %v638_v39, %v313_v44 }
  0xeb   :  { %424 = vst.msk [vmem:[%s733_s3 + $0x18] sm:$0xf] %vm417_vm2, %v481_v41  ;;  %v479_v51 = vpack.c.bf16 %v341_v45, %v341_v45  ;;  %v344_v53 = vmax.f32 %v328_v47, 0.0 }
  0xec   :  { %432 = vst.msk [vmem:[%s733_s3 + $0x38] sm:$0xf] %vm417_vm2, %v489_v42  ;;  %v303_v49 = vld [vmem:[#allocation2 + $0x28] sm:$0xff]  ;;  %v487_v52 = vpack.c.bf16 %v349_v46, %v349_v46  ;;  %v352_v54 = vmax.f32 %v336_v48, 0.0 }
  0xed   :  { %v311_v50 = vld [vmem:[#allocation2 + $0x68] sm:$0xff]  ;;  %v326_v55 = vadd.f32 %v638_v39, %v303_v49  ;;  %422 = vst.msk [vmem:[%s733_s3 + $0x10] sm:$0xf] %vm417_vm2, %v479_v51  ;;  %v482_v57 = vpack.c.bf16 %v344_v53, %v344_v53 }
  0xee   :  { %v334_v56 = vadd.f32 %v638_v39, %v311_v50  ;;  %430 = vst.msk [vmem:[%s733_s3 + $0x30] sm:$0xf] %vm417_vm2, %v487_v52  ;;  %v490_v58 = vpack.c.bf16 %v352_v54, %v352_v54 }
  0xef   :  { %v342_v59 = vmax.f32 %v326_v55, 0.0  ;;  %425 = vst.msk [vmem:[%s733_s3 + $0x1c] sm:$0xf] %vm417_vm2, %v482_v57 }
  0xf0   :  { %v350_v60 = vmax.f32 %v334_v56, 0.0  ;;  %433 = vst.msk [vmem:[%s733_s3 + $0x3c] sm:$0xf] %vm417_vm2, %v490_v58 }
  0xf1   :  { %v480_v39 = vpack.c.bf16 %v342_v59, %v342_v59 }
  0xf2   :  { %v488_v61 = vpack.c.bf16 %v350_v60, %v350_v60 }
  0xf3   :  { %423 = vst.msk [vmem:[%s733_s3 + $0x14] sm:$0xf] %vm417_vm2, %v480_v39 }
  0xf4   :  { %431 = vst.msk [vmem:[%s733_s3 + $0x34] sm:$0xf] %vm417_vm2, %v488_v61 }

// kernel: resnet_deep_branch_forward.11
= control target key start
LH: loop header
LB: loop body
LE: loop exit
PB: predicated region body
PF: predicated region fallthrough
CT: control target
= control target key end

     0   :  { %vm19_vm0 = vcmask 261120   ;;  %v472_v24 = vmov 0.0   ;;  %vm361_vm1 = vcmask 257024   ;;  %s594_s1 = inlined_call_operand.vmem [shape: bf16[288,32], index: 1, kind: input, shape index: {}]   ;;  %s595_s0 = inlined_call_operand.vmem [shape: bf16[32,288], index: 0, kind: input, shape index: {}]   ;;  %s596_s2 = inlined_call_operand.vmem [shape: f32[1,32], index: 2, kind: input, shape index: {}]   ;;  %s597_s3 = inlined_call_operand.vmem [shape: bf16[32,32], index: 3, kind: output, shape index: {}]  }
   0x1   :  { %v446_v0 = vld [vmem:[%s594_s1 + $0x78] sm:$0xff]   ;;  %v448_v2 = vld [vmem:[%s594_s1 + $0x70] sm:$0xff]   ;;  %v450_v4 = vld [vmem:[%s594_s1 + $0x68] sm:$0xff]   ;;  %20 = vst.msk [vmem:[#allocation2] sm:$0xff] %vm19_vm0, %v472_v24 }
   0x2   :  { %v447_v1 = vld [vmem:[%s594_s1 + $0x38] sm:$0xff]   ;;  %405 = vmatprep.subr.bf16.mxu0 %v446_v0  ;;  %v449_v3 = vld [vmem:[%s594_s1 + $0x30] sm:$0xff]   ;;  %v451_v5 = vld [vmem:[%s594_s1 + $0x28] sm:$0xff]   ;;  %21 = vst.msk [vmem:[#allocation2 + $0x8] sm:$0xff] %vm19_vm0, %v472_v24 }
   0x3   :  { %406 = vmatpush3.bf16.msra.mxu0 %v447_v1  ;;  %v452_v6 = vld [vmem:[%s594_s1 + $0x60] sm:$0xff]   ;;  %v454_v8 = vld [vmem:[%s594_s1 + $0x58] sm:$0xff]   ;;  %v460_v9 = vld [vmem:[%s594_s1 + $0x88] sm:$0xff]   ;;  %22 = vst.msk [vmem:[#allocation2 + $0x10] sm:$0xff] %vm19_vm0, %v472_v24 }
   0x4   :  { %407 = vmatprep.subr.bf16.mxu0 %v448_v2  ;;  %v453_v7 = vld [vmem:[%s594_s1 + $0x20] sm:$0xff]   ;;  %v455_v10 = vld [vmem:[%s594_s1 + $0x18] sm:$0xff]   ;;  %v456_v11 = vld [vmem:[%s594_s1 + $0x50] sm:$0xff]   ;;  %437 = vmatprep.subr.bf16.mxu1 %v460_v9  ;;  %23 = vst.msk [vmem:[#allocation2 + $0x18] sm:$0xff] %vm19_vm0, %v472_v24 }
   0x5   :  { %v457_v12 = vld [vmem:[%s594_s1 + $0x10] sm:$0xff]   ;;  %438 = vmatpush3.bf16.msra.mxu1 %v460_v9  ;;  %v463_v13 = vld [vmem:[%s594_s1 + $0x80] sm:$0xff]   ;;  %v458_v14 = vld [vmem:[%s594_s1 + $0x48] sm:$0xff]  }
   0x6   :  { %439 = vmatprep.subr.bf16.mxu1 %v463_v13  ;;  %v466_v15 = vld [vmem:[%s595_s0 + $0x4] ss:$12 sps:$4 sm:$0xff]   ;;  %v467_v16 = vld [vmem:[%s595_s0 + $0x8] ss:$12 sps:$4 sm:$0xff]   ;;  %v468_v17 = vld [vmem:[%s595_s0 + $0x20] ss:$12 sps:$4 sm:$0xff]  }
   0x7   :  { %408 = vmatpush3.bf16.msra.mxu0 %v449_v3  ;;  %249 = vmatprep.mubr.bf16.mxu0 %v466_v15  ;;  %v459_v18 = vld [vmem:[%s594_s1 + $0x8] sm:$0xff]   ;;  %v461_v19 = vld [vmem:[%s594_s1 + $0x40] sm:$0xff]  }
   0x8   :  { %409 = vmatprep.subr.bf16.mxu0 %v450_v4  ;;  %441 = vmatprep.mubr.msk.bf16.mxu1 %vm19_vm0, %v467_v16  ;;  %v462_v20 = vld [vmem:[%s594_s1] sm:$0xff]   ;;  %v469_v22 = vld [vmem:[%s595_s0 + $0x1c] ss:$12 sps:$4 sm:$0xff]  }
   0x9   :  { %440 = vmatpush3.bf16.msra.mxu1 %v463_v13  ;;  %v464_v21 = vld [vmem:[%s595_s0] ss:$12 sps:$4 sm:$0xff]   ;;  %v471_v23 = vld [vmem:[%s595_s0 + $0x18] ss:$12 sps:$4 sm:$0xff]  }
   0xa   :  { %v24_v32 = vld [vmem:[#allocation2] sm:$0xff]  ;;  %v25_v39 = vld [vmem:[#allocation2 + $0x8] sm:$0xff]  ;;  %v26_v44 = vld [vmem:[#allocation2 + $0x10] sm:$0xff] }
   0xb   :  { %410 = vmatpush3.bf16.msra.mxu0 %v451_v5  ;;  %v396_v47 = vld [vmem:[%s596_s2] ss:$0 sm:$0xff]  ;;  %v27_v52 = vld [vmem:[#allocation2 + $0x18] sm:$0xff] }
   0xc   :  { %411 = vmatprep.subr.bf16.mxu0 %v452_v6  ;;  %442 = vmatmul.mubr.msk.bf16.vlgmr.msra.gmra.mxu1 %vm19_vm0, %v468_v17 }
   0xf   :  { %412 = vmatpush3.bf16.msra.mxu0 %v453_v7 }
  0x10   :  { %413 = vmatprep.subr.bf16.mxu0 %v454_v8 }
  0x13   :  { %414 = vmatpush3.bf16.msra.mxu0 %v455_v10 }
  0x14   :  { %415 = vmatprep.subr.bf16.mxu0 %v456_v11 }
  0x17   :  { %416 = vmatpush3.bf16.msra.mxu0 %v457_v12 }
  0x18   :  { %417 = vmatprep.subr.bf16.mxu0 %v458_v14 }
  0x1b   :  { %418 = vmatpush3.bf16.msra.mxu0 %v459_v18 }
  0x1c   :  { %419 = vmatprep.subr.bf16.mxu0 %v461_v19 }
  0x1f   :  { %420 = vmatpush3.bf16.msra.mxu0 %v462_v20 }
  0x22   :  { %250 = vmatmul.mubr.bf16.vlgmr.msra.gmra.mxu0 %v464_v21 }
  0x23   :  { %257 = vmatprep.mubr.bf16.mxu0 %v469_v22 }
  0x2a   :  { %258 = vmatmul.mubr.bf16.gmra.mxu0 %v471_v23 }
  0xcc   :  { %v443_v25 = vpop.f32.mrf.mxu1 }
  0xce   :  { %v300_v26 = vpop.f32.mrf.mxu1 }
  0xd0   :  { %v444_v29 = vpop.f32.mrf.mxu1 }
  0xd2   :  { %v303_v35 = vpop.f32.mrf.mxu1 }
  0xe2   :  { %v421_v27 = vpop.f32.mrf.mxu0 }
  0xe4   :  { %v422_v28 = vpop.f32.mrf.mxu0 }
  0xe5   :  { %v423_v30 = vadd.f32 %v422_v28, %v421_v27 }
  0xe6   :  { %v424_v31 = vpop.f32.mrf.mxu0 }
  0xe7   :  { %v301_v33 = vadd.f32 %v423_v30, %v300_v26 }
  0xe8   :  { %v425_v34 = vpop.f32.mrf.mxu0 }
  0xe9   :  { %v315_v36 = vadd.f32 %v301_v33, %v24_v32  ;;  %v426_v37 = vadd.f32 %v425_v34, %v424_v31 }
  0xea   :  { %v427_v38 = vpop.f32.mrf.mxu0 }
  0xeb   :  { %319 = vst.msk [vmem:[#allocation2] sm:$0xff] %vm19_vm0, %v315_v36  ;;  %v304_v40 = vadd.f32 %v426_v37, %v303_v35 }
  0xec   :  { %v428_v41 = vpop.f32.mrf.mxu0 }
  0xed   :  { %v316_v42 = vadd.f32 %v304_v40, %v25_v39  ;;  %v429_v43 = vadd.f32 %v428_v41, %v427_v38 }
  0xee   :  { %v430_v45 = vpop.f32.mrf.mxu0 }
  0xef   :  { %320 = vst.msk [vmem:[#allocation2 + $0x8] sm:$0xff] %vm19_vm0, %v316_v42  ;;  %v309_v46 = vadd.f32 %v443_v25, %v429_v43 }
  0xf0   :  { %v431_v48 = vpop.f32.mrf.mxu0 }
  0xf1   :  { %v317_v49 = vadd.f32 %v309_v46, %v26_v44  ;;  %v432_v50 = vadd.f32 %v431_v48, %v430_v45 }
  0xf2   :  { %v326_v51 = vld [vmem:[#allocation2] sm:$0xff] }
  0xf3   :  { %v337_v53 = vadd.f32 %v396_v47, %v326_v51  ;;  %321 = vst.msk [vmem:[#allocation2 + $0x10] sm:$0xff] %vm19_vm0, %v317_v49  ;;  %v312_v54 = vadd.f32 %v444_v29, %v432_v50 }
  0xf5   :  { %v341_v55 = vmax.f32 %v337_v53, 0.0  ;;  %v318_v56 = vadd.f32 %v312_v54, %v27_v52 }
  0xf6   :  { %v327_v57 = vld [vmem:[#allocation2 + $0x8] sm:$0xff] }
  0xf7   :  { %v401_v58 = vpack.c.bf16 %v341_v55, %v341_v55  ;;  %v338_v59 = vadd.f32 %v396_v47, %v327_v57  ;;  %322 = vst.msk [vmem:[#allocation2 + $0x18] sm:$0xff] %vm19_vm0, %v318_v56 }
  0xf9   :  { %362 = vst.msk [vmem:[%s597_s3] sm:$0xf] %vm361_vm1, %v401_v58  ;;  %v342_v60 = vmax.f32 %v338_v59, 0.0 }
  0xfa   :  { %v328_v61 = vld [vmem:[#allocation2 + $0x10] sm:$0xff] }
  0xfb   :  { %v402_v62 = vpack.c.bf16 %v342_v60, %v342_v60  ;;  %v339_v63 = vadd.f32 %v396_v47, %v328_v61 }
  0xfd   :  { %363 = vst.msk [vmem:[%s597_s3 + $0x4] sm:$0xf] %vm361_vm1, %v402_v62  ;;  %v343_v0 = vmax.f32 %v339_v63, 0.0 }
  0xfe   :  { %v329_v1 = vld [vmem:[#allocation2 + $0x18] sm:$0xff] }
  0xff   :  { %v403_v2 = vpack.c.bf16 %v343_v0, %v343_v0  ;;  %v340_v3 = vadd.f32 %v396_v47, %v329_v1 }
 0x101   :  { %364 = vst.msk [vmem:[%s597_s3 + $0x8] sm:$0xf] %vm361_vm1, %v403_v2  ;;  %v344_v4 = vmax.f32 %v340_v3, 0.0 }
 0x103   :  { %v404_v5 = vpack.c.bf16 %v344_v4, %v344_v4 }
 0x105   :  { %365 = vst.msk [vmem:[%s597_s3 + $0xc] sm:$0xf] %vm361_vm1, %v404_v5 }

// kernel: resnet_deep_branch_forward.13
= control target key start
LH: loop header
LB: loop body
LE: loop exit
PB: predicated region body
PF: predicated region fallthrough
CT: control target
= control target key end

     0   :  { %vm60_vm0 = vcmask 261120   ;;  %s285_s1 = inlined_call_operand.vmem [shape: bf16[32,128], index: 1, kind: input, shape index: {}]   ;;  %s286_s0 = inlined_call_operand.vmem [shape: bf16[32,32], index: 0, kind: input, shape index: {}]   ;;  %s287_s2 = inlined_call_operand.vmem [shape: f32[1,128], index: 2, kind: input, shape index: {}]   ;;  %s288_s3 = inlined_call_operand.vmem [shape: bf16[32,128], index: 3, kind: input, shape index: {}]   ;;  %s289_s4 = inlined_call_operand.vmem [shape: bf16[32,128], index: 4, kind: output, shape index: {}]  }
   0x1   :  { %v229_v0 = vld [vmem:[%s285_s1 + $0x8] sm:$0xff]   ;;  %v230_v1 = vld [vmem:[%s285_s1] sm:$0xff]  }
   0x2   :  { %221 = vmatprep.subr.bf16.mxu0 %v229_v0  ;;  %v231_v2 = vld [vmem:[%s286_s0] sm:$0xff]   ;;  %v232_v3 = vld [vmem:[%s286_s0 + $0x8] sm:$0xff]  }
   0x3   :  { %222 = vmatpush3.bf16.msra.mxu0 %v229_v0  ;;  %225 = vmatprep.mubr.msk.bf16.mxu0 %vm60_vm0, %v231_v2  ;;  %v188_v4 = vld [vmem:[%s287_s2] ss:$0 sm:$0xff]  ;;  %v215_v5 = vld [vmem:[%s288_s3 + $0x8] sm:$0xff]  }
   0x4   :  { %223 = vmatprep.subr.bf16.mxu0 %v230_v1  ;;  %v198_v7 = vld [vmem:[%s288_s3] sm:$0xff]   ;;  %v203_v9 = vunpack.c.l.bf16 %v215_v5  ;;  %v204_v13 = vunpack.c.h.bf16 %v215_v5 }
   0x5   :  { %v199_v12 = vunpack.c.l.bf16 %v198_v7  ;;  %v200_v17 = vunpack.c.h.bf16 %v198_v7 }
   0x7   :  { %224 = vmatpush3.bf16.msra.mxu0 %v230_v1 }
   0xa   :  { %226 = vmatmul.mubr.msk.bf16.vlgmr.msra.gmra.mxu0 %vm60_vm0, %v232_v3 }
  0xca   :  { %v227_v6 = vpop.f32.mrf.mxu0 }
  0xcb   :  { %v140_v8 = vadd.f32 %v227_v6, %v188_v4 }
  0xcc   :  { %v101_v10 = vpop.f32.mrf.mxu0 }
  0xcd   :  { %v138_v11 = vadd.f32 %v188_v4, %v101_v10  ;;  %v152_v15 = vadd.f32 %v203_v9, %v140_v8 }
  0xce   :  { %v228_v14 = vpop.f32.mrf.mxu0 }
  0xcf   :  { %v141_v16 = vadd.f32 %v228_v14, %v188_v4  ;;  %v150_v19 = vadd.f32 %v199_v12, %v138_v11  ;;  %v156_v22 = vmax.f32 %v152_v15, 0.0 }
  0xd0   :  { %v104_v18 = vpop.f32.mrf.mxu0 }
  0xd1   :  { %v153_v20 = vadd.f32 %v204_v13, %v141_v16  ;;  %v139_v21 = vadd.f32 %v188_v4, %v104_v18  ;;  %v154_v25 = vmax.f32 %v150_v19, 0.0 }
  0xd3   :  { %v157_v23 = vmax.f32 %v153_v20, 0.0  ;;  %v151_v24 = vadd.f32 %v200_v17, %v139_v21 }
  0xd5   :  { %v213_v26 = vpack.c.bf16 %v157_v23, %v156_v22  ;;  %v155_v27 = vmax.f32 %v151_v24, 0.0 }
  0xd7   :  { %216 = vst [vmem:[%s289_s4 + $0x8] sm:$0xff] %v213_v26   ;;  %v208_v28 = vpack.c.bf16 %v155_v27, %v154_v25 }
  0xd9   :  { %209 = vst [vmem:[%s289_s4] sm:$0xff] %v208_v28  }

// kernel: resnet_deep_branch_forward.12
= control target key start
LH: loop header
LB: loop body
LE: loop exit
PB: predicated region body
PF: predicated region fallthrough
CT: control target
= control target key end

     0   :  { %vm73_vm0 = vcmask 523264   ;;  %s278_s1 = inlined_call_operand.vmem [shape: bf16[64,128], index: 1, kind: input, shape index: {}]   ;;  %s279_s0 = inlined_call_operand.vmem [shape: bf16[32,64], index: 0, kind: input, shape index: {}]   ;;  %s280_s2 = inlined_call_operand.vmem [shape: f32[1,128], index: 2, kind: input, shape index: {}]   ;;  %s281_s3 = inlined_call_operand.vmem [shape: bf16[32,128], index: 3, kind: output, shape index: {}]  }
   0x1   :  { %v225_v0 = vld [vmem:[%s278_s1 + $0x18] sm:$0xff]   ;;  %v226_v1 = vld [vmem:[%s278_s1 + $0x10] sm:$0xff]   ;;  %v227_v2 = vld [vmem:[%s278_s1 + $0x8] sm:$0xff]  }
   0x2   :  { %213 = vmatprep.subr.bf16.mxu0 %v225_v0  ;;  %v229_v3 = vld [vmem:[%s279_s0] sm:$0xff]   ;;  %v230_v5 = vld [vmem:[%s279_s0 + $0x8] sm:$0xff]  }
   0x3   :  { %214 = vmatpush3.bf16.msra.mxu0 %v225_v0  ;;  %221 = vmatprep.mubr.msk.bf16.mxu0 %vm73_vm0, %v229_v3  ;;  %v228_v4 = vld [vmem:[%s278_s1] sm:$0xff]  }
   0x4   :  { %215 = vmatprep.subr.bf16.mxu0 %v226_v1  ;;  %v187_v7 = vld [vmem:[%s280_s2] ss:$0 sm:$0xff] }
   0x7   :  { %216 = vmatpush3.bf16.msra.mxu0 %v226_v1 }
   0x8   :  { %217 = vmatprep.subr.bf16.mxu0 %v227_v2 }
   0xb   :  { %218 = vmatpush3.bf16.msra.mxu0 %v227_v2 }
   0xc   :  { %219 = vmatprep.subr.bf16.mxu0 %v228_v4 }
   0xf   :  { %220 = vmatpush3.bf16.msra.mxu0 %v228_v4 }
  0x12   :  { %222 = vmatmul.mubr.msk.bf16.vlgmr.msra.gmra.mxu0 %vm73_vm0, %v230_v5 }
  0xd2   :  { %v223_v6 = vpop.f32.mrf.mxu0 }
  0xd3   :  { %v153_v10 = vadd.f32 %v223_v6, %v187_v7 }
  0xd4   :  { %v114_v8 = vpop.f32.mrf.mxu0 }
  0xd5   :  { %v151_v13 = vadd.f32 %v187_v7, %v114_v8 }
  0xd6   :  { %v224_v9 = vpop.f32.mrf.mxu0 }
  0xd7   :  { %v154_v11 = vadd.f32 %v224_v9, %v187_v7 }
  0xd8   :  { %v117_v12 = vpop.f32.mrf.mxu0 }
  0xd9   :  { %v204_v14 = vpack.c.bf16 %v154_v11, %v153_v10  ;;  %v152_v15 = vadd.f32 %v187_v7, %v117_v12 }
  0xdb   :  { %206 = vst [vmem:[%s281_s3 + $0x8] sm:$0xff] %v204_v14   ;;  %v199_v16 = vpack.c.bf16 %v152_v15, %v151_v13 }
  0xdd   :  { %200 = vst [vmem:[%s281_s3] sm:$0xff] %v199_v16  }

// kernel: resnet_deep_branch_forward.14
= control target key start
LH: loop header
LB: loop body
LE: loop exit
PB: predicated region body
PF: predicated region fallthrough
CT: control target
= control target key end

     0   :  { %vm19_vm0 = vcmask 261120   ;;  %v273_v1 = vmov 0.0   ;;  %vm204_vm1 = vcmask 257024   ;;  %s347_s1 = inlined_call_operand.vmem [shape: bf16[128,32], index: 1, kind: input, shape index: {}]   ;;  %s348_s0 = inlined_call_operand.vmem [shape: bf16[32,128], index: 0, kind: input, shape index: {}]   ;;  %s349_s2 = inlined_call_operand.vmem [shape: f32[1,32], index: 2, kind: input, shape index: {}]   ;;  %s350_s3 = inlined_call_operand.vmem [shape: bf16[32,32], index: 3, kind: output, shape index: {}]  }
   0x1   :  { %v263_v0 = vld [vmem:[%s347_s1 + $0x38] sm:$0xff]   ;;  %22 = vst.msk [vmem:[#allocation2 + $0x10] sm:$0xff] %vm19_vm0, %v273_v1  ;;  %20 = vst.msk [vmem:[#allocation2] sm:$0xff] %vm19_vm0, %v273_v1  ;;  %v264_v2 = vld [vmem:[%s347_s1 + $0x30] sm:$0xff]  }
   0x2   :  { %21 = vst.msk [vmem:[#allocation2 + $0x8] sm:$0xff] %vm19_vm0, %v273_v1  ;;  %23 = vst.msk [vmem:[#allocation2 + $0x18] sm:$0xff] %vm19_vm0, %v273_v1  ;;  %242 = vmatprep.subr.bf16.mxu0 %v263_v0  ;;  %v265_v3 = vld [vmem:[%s347_s1 + $0x28] sm:$0xff]   ;;  %v266_v4 = vld [vmem:[%s347_s1 + $0x20] sm:$0xff]  }
   0x3   :  { %243 = vmatpush3.bf16.msra.mxu0 %v263_v0  ;;  %v271_v5 = vld [vmem:[%s348_s0] sm:$0xff]   ;;  %v267_v6 = vld [vmem:[%s347_s1 + $0x18] sm:$0xff]   ;;  %v268_v7 = vld [vmem:[%s347_s1 + $0x10] sm:$0xff]  }
   0x4   :  { %244 = vmatprep.subr.bf16.mxu0 %v264_v2  ;;  %258 = vmatprep.mubr.bf16.mxu0 %v271_v5  ;;  %v269_v8 = vld [vmem:[%s347_s1 + $0x8] sm:$0xff]   ;;  %v270_v9 = vld [vmem:[%s347_s1] sm:$0xff]  }
   0x5   :  { %v272_v10 = vld [vmem:[%s348_s0 + $0x8] sm:$0xff]   ;;  %v223_v23 = vld [vmem:[%s349_s2] ss:$0 sm:$0xff] }
   0x7   :  { %245 = vmatpush3.bf16.msra.mxu0 %v264_v2 }
   0x8   :  { %246 = vmatprep.subr.bf16.mxu0 %v265_v3  ;;  %v26_v11 = vld [vmem:[#allocation2 + $0x10] sm:$0xff]  ;;  %v24_v13 = vld [vmem:[#allocation2] sm:$0xff] }
   0x9   :  { %v27_v16 = vld [vmem:[#allocation2 + $0x18] sm:$0xff]  ;;  %v25_v19 = vld [vmem:[#allocation2 + $0x8] sm:$0xff] }
   0xb   :  { %247 = vmatpush3.bf16.msra.mxu0 %v265_v3 }
   0xc   :  { %248 = vmatprep.subr.bf16.mxu0 %v266_v4 }
   0xf   :  { %249 = vmatpush3.bf16.msra.mxu0 %v266_v4 }
  0x10   :  { %250 = vmatprep.subr.bf16.mxu0 %v267_v6 }
  0x13   :  { %251 = vmatpush3.bf16.msra.mxu0 %v267_v6 }
  0x14   :  { %252 = vmatprep.subr.bf16.mxu0 %v268_v7 }
  0x17   :  { %253 = vmatpush3.bf16.msra.mxu0 %v268_v7 }
  0x18   :  { %254 = vmatprep.subr.bf16.mxu0 %v269_v8 }
  0x1b   :  { %255 = vmatpush3.bf16.msra.mxu0 %v269_v8 }
  0x1c   :  { %256 = vmatprep.subr.bf16.mxu0 %v270_v9 }
  0x1f   :  { %257 = vmatpush3.bf16.msra.mxu0 %v270_v9 }
  0x22   :  { %259 = vmatmul.mubr.bf16.vlgmr.msra.gmra.mxu0 %v272_v10 }
  0xe2   :  { %v260_v12 = vpop.f32.mrf.mxu0 }
  0xe3   :  { %v159_v14 = vadd.f32 %v260_v12, %v26_v11 }
  0xe4   :  { %v142_v15 = vpop.f32.mrf.mxu0 }
  0xe5   :  { %164 = vst.msk [vmem:[#allocation2 + $0x10] sm:$0xff] %vm19_vm0, %v159_v14  ;;  %v157_v17 = vadd.f32 %v142_v15, %v24_v13 }
  0xe6   :  { %v261_v18 = vpop.f32.mrf.mxu0 }
  0xe7   :  { %162 = vst.msk [vmem:[#allocation2] sm:$0xff] %vm19_vm0, %v157_v17  ;;  %v160_v20 = vadd.f32 %v261_v18, %v27_v16 }
  0xe8   :  { %v145_v21 = vpop.f32.mrf.mxu0 }
  0xe9   :  { %165 = vst.msk [vmem:[#allocation2 + $0x18] sm:$0xff] %vm19_vm0, %v160_v20  ;;  %v158_v22 = vadd.f32 %v145_v21, %v25_v19 }
  0xeb   :  { %163 = vst.msk [vmem:[#allocation2 + $0x8] sm:$0xff] %vm19_vm0, %v158_v22 }
  0xec   :  { %v171_v24 = vld [vmem:[#allocation2 + $0x10] sm:$0xff] }
  0xed   :  { %v182_v25 = vadd.f32 %v223_v23, %v171_v24 }
  0xee   :  { %v169_v26 = vld [vmem:[#allocation2] sm:$0xff] }
  0xef   :  { %v186_v27 = vmax.f32 %v182_v25, 0.0  ;;  %v180_v28 = vadd.f32 %v223_v23, %v169_v26 }
  0xf0   :  { %v172_v29 = vld [vmem:[#allocation2 + $0x18] sm:$0xff] }
  0xf1   :  { %v230_v30 = vpack.c.bf16 %v186_v27, %v186_v27  ;;  %v184_v31 = vmax.f32 %v180_v28, 0.0  ;;  %v183_v32 = vadd.f32 %v223_v23, %v172_v29 }
  0xf2   :  { %v170_v33 = vld [vmem:[#allocation2 + $0x8] sm:$0xff] }
  0xf3   :  { %207 = vst.msk [vmem:[%s350_s3 + $0x8] sm:$0xf] %vm204_vm1, %v230_v30  ;;  %v228_v34 = vpack.c.bf16 %v184_v31, %v184_v31  ;;  %v187_v35 = vmax.f32 %v183_v32, 0.0  ;;  %v181_v36 = vadd.f32 %v223_v23, %v170_v33 }
  0xf5   :  { %205 = vst.msk [vmem:[%s350_s3] sm:$0xf] %vm204_vm1, %v228_v34  ;;  %v231_v37 = vpack.c.bf16 %v187_v35, %v187_v35  ;;  %v185_v38 = vmax.f32 %v181_v36, 0.0 }
  0xf7   :  { %208 = vst.msk [vmem:[%s350_s3 + $0xc] sm:$0xf] %vm204_vm1, %v231_v37  ;;  %v229_v39 = vpack.c.bf16 %v185_v38, %v185_v38 }
  0xf9   :  { %206 = vst.msk [vmem:[%s350_s3 + $0x4] sm:$0xf] %vm204_vm1, %v229_v39 }

</bundles_post_ra>
